<compile_context>
chip_gen: v7x
topology: tpu7x:2x2x1
jax: 0.10.0
libtpu: 0.0.40
codegen_flags: <defaults>
</compile_context>

<pallas_src>
import numpy as np
import jax
import jax.numpy as jnp
from jax.experimental import pallas as pl
from jax.experimental.pallas import tpu as pltpu


def _round_up(x, m):
    return ((x + m - 1) // m) * m


def _pos_embed_kernel(ids_ref, freq_ref, cos_ref, sin_ref):
    # ids_ref:  [tile_s, n_axes] f32 position ids
    # freq_ref: [n_axes, D]      f32 repeat-interleaved inverse frequencies,
    #                            zero outside that axis's column block.
    # angles[s, c] = ids[s, axis(c)] * inv_freq[c]  (sum is exact: other rows are 0)
    n_axes = ids_ref.shape[1]
    angles = ids_ref[:, 0:1] * freq_ref[0:1, :]
    for i in range(1, n_axes):                      # static unroll, VPU broadcast-FMA
        angles = angles + ids_ref[:, i:i + 1] * freq_ref[i:i + 1, :]
    cos_ref[...] = jnp.cos(angles)
    sin_ref[...] = jnp.sin(angles)


def flux_pos_embed(ids, axes_dim, theta, *, tile_s=512):
    """ids: [S, n_axes] (any real dtype). Returns (freqs_cos, freqs_sin) [S, D] f32."""
    ids = jnp.asarray(ids, jnp.float32)
    S, n_axes = ids.shape
    assert n_axes == len(axes_dim)
    D = int(sum(axes_dim))

    # Host glue: per-axis rows of repeat-interleaved inverse frequencies.
    freq_rows = np.zeros((n_axes, D), np.float32)
    off = 0
    for i, d in enumerate(axes_dim):
        assert d % 2 == 0
        half = d // 2
        f = 1.0 / (float(theta) ** (np.arange(0, d, 2, dtype=np.float64)[:half] / d))
        freq_rows[i, off:off + d] = np.repeat(f, 2)     # repeat_interleave(2, dim=1)
        off += d

    # Tile over S (sublane constraint: multiple of 8); pad and slice back.
    tile_s = int(min(tile_s, _round_up(S, 8)))
    tile_s = _round_up(tile_s, 8)
    S_pad = _round_up(S, tile_s)
    if S_pad != S:
        ids = jnp.pad(ids, ((0, S_pad - S), (0, 0)))
    grid = (S_pad // tile_s,)

    out_shape = (jax.ShapeDtypeStruct((S_pad, D), jnp.float32),
                 jax.ShapeDtypeStruct((S_pad, D), jnp.float32))

    cos, sin = pl.pallas_call(
        _pos_embed_kernel,
        out_shape=out_shape,
        grid=grid,
        in_specs=[
            pl.BlockSpec((tile_s, n_axes), lambda i: (i, 0)),   # ids tile
            pl.BlockSpec((n_axes, D), lambda i: (0, 0)),        # freq rows (replicated)
        ],
        out_specs=(
            pl.BlockSpec((tile_s, D), lambda i: (i, 0)),
            pl.BlockSpec((tile_s, D), lambda i: (i, 0)),
        ),
        compiler_params=pltpu.CompilerParams(
            dimension_semantics=("parallel",)),
    )(ids, jnp.asarray(freq_rows))

    if S_pad != S:
        cos = cos[:S]
        sin = sin[:S]
    return cos, sin


def _reference_numpy(ids, axes_dim, theta):
    ids = np.asarray(ids, np.float64)
    cos_out, sin_out = [], []
    for i, d in enumerate(axes_dim):
        half = d // 2
        freqs = 1.0 / (float(theta) ** (np.arange(0, d, 2, dtype=np.float64)[:half] / d))
        ang = np.outer(ids[:, i], freqs)                          # [S, d/2]
        cos_out.append(np.repeat(np.cos(ang), 2, axis=1))
        sin_out.append(np.repeat(np.sin(ang), 2, axis=1))
    return (np.concatenate(cos_out, axis=-1).astype(np.float32),
            np.concatenate(sin_out, axis=-1).astype(np.float32))


if __name__ == "__main__":
    theta = 10000
    axes_dim = [16, 56, 56]          # Flux-style axes; D = 128

    key = jax.random.PRNGKey(0)
    k1, k2 = jax.random.split(key)

    # Case 1: tiny sequence (single tile, no padding needed beyond sublane align).
    S1 = 8
    ids1 = jax.random.randint(k1, (S1, len(axes_dim)), 0, 64).astype(jnp.float32)
    cos1, sin1 = flux_pos_embed(ids1, axes_dim, theta)
    cos1, sin1 = jax.block_until_ready((cos1, sin1))
    ref_cos1, ref_sin1 = _reference_numpy(np.asarray(ids1), axes_dim, theta)
    np.testing.assert_allclose(np.asarray(cos1), ref_cos1, atol=2e-4, rtol=2e-4)
    np.testing.assert_allclose(np.asarray(sin1), ref_sin1, atol=2e-4, rtol=2e-4)

    # Case 2: non-multiple sequence with multiple grid tiles (exercises padding path).
    S2 = 300
    ids2 = jax.random.randint(k2, (S2, len(axes_dim)), 0, 64).astype(jnp.float32)
    cos2, sin2 = flux_pos_embed(ids2, axes_dim, theta, tile_s=128)
    cos2, sin2 = jax.block_until_ready((cos2, sin2))
    ref_cos2, ref_sin2 = _reference_numpy(np.asarray(ids2), axes_dim, theta)
    np.testing.assert_allclose(np.asarray(cos2), ref_cos2, atol=2e-4, rtol=2e-4)
    np.testing.assert_allclose(np.asarray(sin2), ref_sin2, atol=2e-4, rtol=2e-4)

    print("KERNEL_OK")
</pallas_src>

<mosaic_0001>
module attributes {stable_mosaic.version = 11 : i64} {
  func.func @_pos_embed_kernel(%arg0: i32, %arg1: memref<8x3xf32, #tpu.memory_space<vmem>>, %arg2: memref<3x128xf32, #tpu.memory_space<vmem>>, %arg3: memref<8x128xf32, #tpu.memory_space<vmem>>, %arg4: memref<8x128xf32, #tpu.memory_space<vmem>>) attributes {dimension_semantics = [#tpu.dimension_semantics<parallel>], iteration_bounds = array<i64: 1>, scalar_prefetch = 0 : i64, scratch_operands = 0 : i64, tpu.core_type = #tpu.core_type<tc>, window_params = [{transform_indices = @transform_0, window_bounds = array<i64: 8, 3>}, {pipeline_mode = #tpu.pipeline_mode<synchronous>, transform_indices = @transform_1, window_bounds = array<i64: 3, 128>}, {transform_indices = @transform_2, window_bounds = array<i64: 8, 128>}, {transform_indices = @transform_3, window_bounds = array<i64: 8, 128>}]} {
    %c0 = arith.constant 0 : index
    %c0_0 = arith.constant 0 : index
    %0 = vector.load %arg1[%c0, %c0_0] : memref<8x3xf32, #tpu.memory_space<vmem>>, vector<8x1xf32>
    %c0_1 = arith.constant 0 : index
    %c0_2 = arith.constant 0 : index
    %1 = vector.load %arg2[%c0_1, %c0_2] : memref<3x128xf32, #tpu.memory_space<vmem>>, vector<1x128xf32>
    %2 = vector.broadcast %0 : vector<8x1xf32> to vector<8x128xf32>
    %3 = vector.broadcast %1 : vector<1x128xf32> to vector<8x128xf32>
    %4 = arith.mulf %2, %3 : vector<8x128xf32>
    %c0_3 = arith.constant 0 : index
    %c1 = arith.constant 1 : index
    %5 = vector.load %arg1[%c0_3, %c1] : memref<8x3xf32, #tpu.memory_space<vmem>>, vector<8x1xf32>
    %c1_4 = arith.constant 1 : index
    %c0_5 = arith.constant 0 : index
    %6 = vector.load %arg2[%c1_4, %c0_5] : memref<3x128xf32, #tpu.memory_space<vmem>>, vector<1x128xf32>
    %7 = vector.broadcast %5 : vector<8x1xf32> to vector<8x128xf32>
    %8 = vector.broadcast %6 : vector<1x128xf32> to vector<8x128xf32>
    %9 = arith.mulf %7, %8 : vector<8x128xf32>
    %10 = arith.addf %4, %9 : vector<8x128xf32>
    %c0_6 = arith.constant 0 : index
    %c2 = arith.constant 2 : index
    %11 = vector.load %arg1[%c0_6, %c2] : memref<8x3xf32, #tpu.memory_space<vmem>>, vector<8x1xf32>
    %c2_7 = arith.constant 2 : index
    %c0_8 = arith.constant 0 : index
    %12 = vector.load %arg2[%c2_7, %c0_8] : memref<3x128xf32, #tpu.memory_space<vmem>>, vector<1x128xf32>
    %13 = vector.broadcast %11 : vector<8x1xf32> to vector<8x128xf32>
    %14 = vector.broadcast %12 : vector<1x128xf32> to vector<8x128xf32>
    %15 = arith.mulf %13, %14 : vector<8x128xf32>
    %16 = arith.addf %10, %15 : vector<8x128xf32>
    %17 = math.cos %16 : vector<8x128xf32>
    %c0_9 = arith.constant 0 : index
    %c0_10 = arith.constant 0 : index
    %18 = vector.load %arg3[%c0_9, %c0_10] : memref<8x128xf32, #tpu.memory_space<vmem>>, vector<8x128xf32>
    tpu.vector_store %arg3[%c0_9, %c0_10], %17 {strides = array<i32>} : memref<8x128xf32, #tpu.memory_space<vmem>>, vector<8x128xf32>,
    %19 = math.sin %16 : vector<8x128xf32>
    %c0_11 = arith.constant 0 : index
    %c0_12 = arith.constant 0 : index
    %20 = vector.load %arg4[%c0_11, %c0_12] : memref<8x128xf32, #tpu.memory_space<vmem>>, vector<8x128xf32>
    tpu.vector_store %arg4[%c0_11, %c0_12], %19 {strides = array<i32>} : memref<8x128xf32, #tpu.memory_space<vmem>>, vector<8x128xf32>,
    return
  }
  func.func @transform_0(%arg0: i32) -> (i32, i32) {
    %c0_i32 = arith.constant 0 : i32
    %c0_i32_0 = arith.constant 0 : i32
    return %arg0, %c0_i32 : i32, i32
  }
  func.func @transform_1(%arg0: i32) -> (i32, i32) {
    %c0_i32 = arith.constant 0 : i32
    %c0_i32_0 = arith.constant 0 : i32
    %c0_i32_1 = arith.constant 0 : i32
    return %c0_i32, %c0_i32_0 : i32, i32
  }
  func.func @transform_2(%arg0: i32) -> (i32, i32) {
    %c0_i32 = arith.constant 0 : i32
    %c0_i32_0 = arith.constant 0 : i32
    return %arg0, %c0_i32 : i32, i32
  }
  func.func @transform_3(%arg0: i32) -> (i32, i32) {
    %c0_i32 = arith.constant 0 : i32
    %c0_i32_0 = arith.constant 0 : i32
    return %arg0, %c0_i32 : i32, i32
  }
}

</mosaic_0001>

<bundles_post_ra>
// kernel: tpu_custom_call.1
= control target key start
LH: loop header
LB: loop body
LE: loop exit
PB: predicated region body
PF: predicated region fallthrough
CT: control target
= control target key end

     0   :  { %9 = vsyncpa [#allocation3], 0  ;;  %v368_v1 = vmov 0   ;;  %v369_v2 = vmov 2   ;;  %s456_s0 = inlined_call_operand.vmem [shape: f32[8,3], index: 0, kind: input, shape index: {}]   ;;  %s457_s1 = inlined_call_operand.vmem [shape: f32[3,128], index: 1, kind: input, shape index: {}]   ;;  %s458_s2 = inlined_call_operand.hbm [shape: f32[8,128], index: 2, kind: output, shape index: {0}]   ;;  %s459_s3 = inlined_call_operand.hbm [shape: f32[8,128], index: 3, kind: output, shape index: {1}]  }
   0x1   :  { %v15_v0 = vld [vmem:[%s456_s0] sm:$0xff]  ;;  %312 = vset.pattern.permute.xlu0 %v368_v1  ;;  %314 = vset.pattern.permute.xlu1 %v369_v2 }
   0x2   :  { %10 = vsyncpa [#allocation5], 0  ;;  %19 = vperm.xlu0 %312, %v15_v0   ;;  %40 = vperm.xlu1 %314, %v15_v0   ;;  %v370_v3 = vmov 1   ;;  %v286_v5 = vld [vmem:[%s457_s1] ss:$0 sm:$0xff]  ;;  %s378_s20 = smov [#allocation4]  }
   0x3   :  { %v287_v6 = vld [vmem:[%s457_s1 + $0x1] ss:$0 sm:$0xff]  ;;  %v288_v7 = vld [vmem:[%s457_s1 + $0x2] ss:$0 sm:$0xff]  ;;  %v371_v25 = vmov 683565275  }
   0x4   :  { %v372_v27 = vmov 2475754826   ;;  %v373_v30 = vmov 2131351028   ;;  %v374_v33 = vmov 2102212464  }
   0x5   :  { %v375_v36 = vmov 920167782   ;;  %v376_v39 = vmov 1326507024   ;;  %s377_s1 = smov [#allocation2]   ;;  %s274_s21 = sshll.u32 %s378_s20, 4  ;;  %s275_s21 = int_to_ptr.vmem [resolvable:$true] %s274_s21 }
   0x6   :  { %313 = vset.pattern.permute.xlu0 %v370_v3  ;;  %s264_s19 = sshll.u32 %s377_s1, 4  ;;  %s265_s19 = int_to_ptr.vmem [resolvable:$true] %s264_s19 }
   0x7   :  { %29 = vperm.xlu0 %313, %v15_v0   ;;  %s320_s22 = scalar_lea.vmem %s265_s19, 128  ;;  %p325_p1 = scmp.lt.s32.totalorder %s265_s19, %s265_s19 }
   0x8   :  { %p321_p0 = scmp.ne.s32.totalorder %s265_s19, %s320_s22  ;;  %p326_p2 = scmp.lt.s32.totalorder %s320_s22, %s320_s22 }
   0xa   :  { %p327_p3 = por %p326_p2, %p325_p1 }
   0xb   :  { %315 = vset.pattern.permute.xlu0 %v369_v2 }
   0xc   :  { %p328_p4 = pnand %p327_p3, %p321_p0 }
  0x81   :  { %v20_v4 = vpop.permute.xlu0 %19  ;;  %v41_v8 = vpop.permute.xlu1 %40 }
  0x82   :  { %v26_v10 = vmul.f32 %v286_v5, %v20_v4  ;;  %v47_v12 = vmul.f32 %v288_v7, %v41_v8 }
  0x86   :  { %v30_v9 = vpop.permute.xlu0 %29 }
  0x87   :  { %v36_v11 = vmul.f32 %v287_v6, %v30_v9 }
  0x89   :  { %v37_v13 = vadd.f32 %v36_v11, %v26_v10 }
  0x8b   :  { %v411_v14 = vadd.f32 %v47_v12, %v37_v13 }
  0x8d   :  { %v52_v15 = vand.u32 2139095040, %v411_v14  ;;  %v49_v19 = vand.u32 2147483647, %v411_v14  ;;  %vm51_vm7 = vcmp.lt.s32.totalorder %v411_v14, 0  ;;  %vm141_vm15 = vweird.f32 %v411_v14 }
  0x8f   :  { %v53_v16 = vshrl.u32 %v52_v15, 23  ;;  %v56_v23 = vand.u32 8388607, %v49_v19  ;;  %vm50_vm8 = vcmp.le.f32.partialorder %v49_v19, 0.7853982 }
  0x91   :  { %v289_v17 = vadd.s32 4294967169, %v53_v16  ;;  %v57_v41 = vor.u32 8388608, %v56_v23 }
  0x93   :  { %v59_v18 = vadd.s32 1, %v289_v17  ;;  %v97_v55 = vshll.u32 %v57_v41, 8 }
  0x95   :  { %vm60_vm0 = vcmp.gt.s32.totalorder %v59_v18, 0 }
  0x96   :  { %v61_v20 = vsel %vm60_vm0, %v59_v18, 0 }
  0x97   :  { %v63_v21 = vand.u32 31, %v61_v20  ;;  %v62_v24 = vshrl.u32 %v61_v20, 5 }
  0x99   :  { %v64_v22 = vsub.s32 32, %v63_v21  ;;  %v66_v26 = vshll.u32 %v371_v25, %v63_v21  ;;  %v69_v28 = vshll.u32 %v372_v27, %v63_v21  ;;  %v72_v32 = vshll.u32 %v373_v30, %v63_v21 }
  0x9a   :  { %v75_v35 = vshll.u32 %v374_v33, %v63_v21  ;;  %v78_v38 = vshll.u32 %v375_v36, %v63_v21  ;;  %vm81_vm1 = vcmp.lt.s32.totalorder %v62_v24, 1  ;;  %vm84_vm2 = vcmp.lt.s32.totalorder %v62_v24, 4 }
  0x9b   :  { %v67_v29 = vshrl.u32 %v372_v27, %v64_v22  ;;  %v70_v31 = vshrl.u32 %v373_v30, %v64_v22  ;;  %v73_v34 = vshrl.u32 %v374_v33, %v64_v22  ;;  %v76_v37 = vshrl.u32 %v375_v36, %v64_v22 }
  0x9c   :  { %v79_v40 = vshrl.u32 %v376_v39, %v64_v22  ;;  %v65_v50 = vshrl.u32 %v371_v25, %v64_v22  ;;  %vm83_vm3 = vcmp.lt.s32.totalorder %v62_v24, 3  ;;  %vm82_vm4 = vcmp.lt.s32.totalorder %v62_v24, 2 }
  0x9d   :  { %v68_v42 = vor.u32 %v67_v29, %v66_v26  ;;  %v71_v43 = vor.u32 %v70_v31, %v69_v28  ;;  %v74_v44 = vor.u32 %v73_v34, %v72_v32  ;;  %v77_v45 = vor.u32 %v76_v37, %v75_v35 }
  0x9e   :  { %v80_v46 = vor.u32 %v79_v40, %v78_v38 }
  0x9f   :  { %v86_v47 = vsel %vm84_vm2, %v74_v44, 2102212464  ;;  %v89_v48 = vsel %vm81_vm1, %v68_v42, %v71_v43  ;;  %v93_v49 = vsel %vm81_vm1, %v71_v43, %v74_v44  ;;  %v90_v51 = vsel %vm84_vm2, %v77_v45, 920167782 }
  0xa0   :  { %v94_v52 = vsel %vm84_vm2, %v80_v46, 1326507024  ;;  %v91_v53 = vsel %vm83_vm3, %v74_v44, %v90_v51  ;;  %v85_v56 = vsel %vm81_vm1, %v65_v50, %v68_v42  ;;  %v87_v57 = vsel %vm83_vm3, %v71_v43, %v86_v47 }
  0xa1   :  { %v95_v54 = vsel %vm83_vm3, %v77_v45, %v94_v52  ;;  %v92_v58 = vsel %vm82_vm4, %v89_v48, %v91_v53  ;;  %v88_v0 = vsel %vm82_vm4, %v85_v56, %v87_v57 }
  0xa2   :  { %v96_v59 = vsel %vm82_vm4, %v93_v49, %v95_v54  ;;  %v420_v62 = vmul.u32.u64.low %v97_v55, %v92_v58  ;;  %v421_v63 = vmul.u32.u64.high %v97_v55, %v92_v58, %v420_v62  ;;  %v104_v2 = vmul.u32 %v97_v55, %v88_v0 }
  0xa3   :  { %v417_v60 = vmul.u32.u64.low %v97_v55, %v96_v59  ;;  %v418_v61 = vmul.u32.u64.high %v97_v55, %v96_v59, %v417_v60 }
  0xa4   :  { %v107_v1 = vadd.s32 1, %v421_v63 }
  0xa5   :  { %vm106_vm5 = vc.u32 %v418_v61, %v420_v62  ;;  %v105_v15 = vadd.s32 %v420_v62, %v418_v61 }
  0xa6   :  { %v108_v3 = vsel %vm106_vm5, %v107_v1, %v421_v63 }
  0xa7   :  { %v109_v4 = vadd.s32 %v108_v3, %v104_v2 }
  0xa9   :  { %v110_v5 = vadd.s32 536870912, %v109_v4 }
  0xab   :  { %v111_v6 = vshrl.u32 %v110_v5, 30 }
  0xad   :  { %v112_v7 = vshll.u32 %v111_v6, 30  ;;  %v135_v28 = vsub.s32 4, %v111_v6 }
  0xaf   :  { %v113_v8 = vsub.s32 %v109_v4, %v112_v7  ;;  %v136_v31 = vsel %vm51_vm7, %v135_v28, %v111_v6 }
  0xb0   :  { %v138_v33 = vsel %vm50_vm8, 0, %v136_v31 }
  0xb1   :  { %v115_v9 = vsub.s32 0, %v113_v8  ;;  %v246_v34 = vadd.s32 3, %v138_v33  ;;  %v142_v35 = vand.u32 3, %v138_v33 }
  0xb3   :  { %v290_v10 = vmin.u32 %v115_v9, %v113_v8  ;;  %v247_v36 = vand.u32 3, %v246_v34  ;;  %vm147_vm9 = vcmp.eq.s32.totalorder %v142_v35, 2  ;;  %vm144_vm11 = vcmp.eq.s32.totalorder %v142_v35, 0 }
  0xb4   :  { %vm143_vm13 = vcmp.lt.s32.totalorder %v142_v35, 2 }
  0xb5   :  { %v117_v11 = vclz %v290_v10  ;;  %vm252_vm10 = vcmp.eq.s32.totalorder %v247_v36, 2  ;;  %vm249_vm12 = vcmp.eq.s32.totalorder %v247_v36, 0  ;;  %vm248_vm14 = vcmp.lt.s32.totalorder %v247_v36, 2 }
  0xb7   :  { %v291_v12 = vadd.s32 4294967294, %v117_v11 }
  0xb9   :  { %vm292_vm6 = vcmp.lt.s32.totalorder %v291_v12, 0 }
  0xba   :  { %v120_v13 = vsel %vm292_vm6, 0, %v291_v12 }
  0xbb   :  { %v121_v16 = vsub.s32 32, %v120_v13  ;;  %v125_v17 = vsub.s32 4294967266, %v120_v13  ;;  %v122_v18 = vshll.u32 %v113_v8, %v120_v13 }
  0xbd   :  { %v123_v20 = vshrl.u32 %v105_v15, %v121_v16  ;;  %v126_v21 = vadd.s32 127, %v125_v17 }
  0xbf   :  { %v124_v22 = vor.u32 %v123_v20, %v122_v18  ;;  %v127_v23 = vshll.u32 %v126_v21, 23 }
  0xc1   :  { %v128_v24 = vor.u32 4788187, %v127_v23  ;;  %v131_v26 = vcvt.s32.f32 %v124_v22 }
  0xc3   :  { %v129_v25 = vand.u32 2147483647, %v128_v24 }
  0xc5   :  { %v132_v27 = vmul.f32 %v131_v26, %v129_v25 }
  0xc7   :  { %v133_v29 = vxor.u32 2147483648, %v132_v27 }
  0xc9   :  { %v134_v30 = vsel %vm51_vm7, %v133_v29, %v132_v27 }
  0xca   :  { %v137_v32 = vsel %vm50_vm8, %v411_v14, %v134_v30 }
  0xcb   :  { %316 = vcosq.f32 %v137_v32 }
  0xcc   :  { %318 = vsinq.f32 %v137_v32 }
  0xd5   :  { %v317_v37 = vpop.eup %316 }
  0xd6   :  { %v319_v38 = vpop.eup %318  ;;  %v148_v39 = vxor.u32 2147483648, %v317_v37 }
  0xd7   :  { %v145_v40 = vxor.u32 2147483648, %v319_v38 }
  0xd8   :  { %v149_v19 = vsel %vm147_vm9, %v148_v39, %v319_v38  ;;  %v254_v41 = vsel %vm252_vm10, %v148_v39, %v319_v38 }
  0xd9   :  { %v146_v42 = vsel %vm144_vm11, %v317_v37, %v145_v40  ;;  %v251_v43 = vsel %vm249_vm12, %v317_v37, %v145_v40 }
  0xda   :  { %v150_v44 = vsel %vm143_vm13, %v146_v42, %v149_v19  ;;  %v255_v45 = vsel %vm248_vm14, %v251_v43, %v254_v41 }
  0xdb   :  { %v151_v46 = vsel %vm141_vm15, nan, %v150_v44  ;;  %v256_v47 = vsel %vm141_vm15, nan, %v255_v45 }
  0xdc   :  { %152 = vst [vmem:[#allocation2] sm:$0xff] %v151_v46  ;;  %257 = vst [vmem:[#allocation4] sm:$0xff] %v256_v47 }
  0xdd   :  { %331 = shalt.err (!%p328_p4)
}
  0xde   :  { %s332_s25 = scalar_lea.hbm %s458_s2, 128 }
  0xdf   :  { %p333_p5 = scmp.ne.s32.totalorder %s458_s2, %s332_s25  ;;  %p336_p6 = scmp.lt.u32.totalorder %s332_s25, %s458_s2 }
  0xe1   :  { %p338_p7 = pnand %p336_p6, %p333_p5 }
  0xe3   :  { %341 = shalt.err (!%p338_p7)
}
  0xe4   :  { %267 = dma.vmem_to_hbm [thread:$0]  %s265_s19, 128, %s458_s2, [#allocation3]  }
  0xe5   :  { %s342_s5 = scalar_lea.vmem %s275_s21, 128  ;;  %p347_p9 = scmp.lt.s32.totalorder %s275_s21, %s275_s21 }
  0xe6   :  { %p343_p8 = scmp.ne.s32.totalorder %s275_s21, %s342_s5  ;;  %p348_p10 = scmp.lt.s32.totalorder %s342_s5, %s342_s5 }
  0xe8   :  { %p349_p11 = por %p348_p10, %p347_p9 }
  0xea   :  { %p350_p12 = pnand %p349_p11, %p343_p8 }
  0xec   :  { %353 = shalt.err (!%p350_p12)
}
  0xed   :  { %s354_s8 = scalar_lea.hbm %s459_s3, 128 }
  0xee   :  { %p355_p13 = scmp.ne.s32.totalorder %s459_s3, %s354_s8  ;;  %p358_p0 = scmp.lt.u32.totalorder %s354_s8, %s459_s3 }
  0xf0   :  { %p360_p1 = pnand %p358_p0, %p355_p13 }
  0xf2   :  { %363 = shalt.err (!%p360_p1)
}
  0xf3   :  { %277 = dma.vmem_to_hbm [thread:$0]  %s275_s21, 128, %s459_s3, [#allocation5]  }
  0xf4   :  { %364 = dma.done.wait [#allocation3], 128  }
  0xf5   :  { %365 = vsyncadd [#allocation3], 4294967168 }
  0xf6   :  { %366 = dma.done.wait [#allocation5], 128  }
  0xf7   :  { %367 = vsyncadd [#allocation5], 4294967168 }
  0xf8   :  { %284 = vsyncpa [#allocation3], 1 }
  0xf9   :  { %285 = vsyncpa [#allocation5], 1 }

</bundles_post_ra>
